<compile_context>
chip_gen: v6e
topology: v6e:2x2x1
jax: 0.10.0
libtpu: 0.0.40
codegen_flags: <defaults>
</compile_context>

<pallas_src>
import math

import jax
import jax.numpy as jnp
from jax.experimental import pallas as pl
from jax.experimental.pallas import tpu as pltpu


def _add_pe_kernel(x_ref, pe_ref, o_ref):
    """Blocks: x_ref/o_ref (rows_tile, lanes) [batch squeezed]; pe_ref (rows_tile, lanes)."""
    o_ref[...] = x_ref[...] + pe_ref[...]


def build_pe_table(max_len, d_model, dtype=jnp.float32):
    """Plain-JAX replica of the PyTorch buffer construction."""
    position = jnp.arange(max_len, dtype=jnp.float32)[:, None]
    div_term = jnp.exp(jnp.arange(0, d_model, 2, dtype=jnp.float32)
                       * (-math.log(10000.0) / d_model))
    ang = position * div_term                          # (max_len, ceil(d_model/2))
    pe = jnp.zeros((max_len, d_model), jnp.float32)
    pe = pe.at[:, 0::2].set(jnp.sin(ang))
    pe = pe.at[:, 1::2].set(jnp.cos(ang[:, : d_model // 2]))
    return pe.astype(dtype)


def _round_up(n, m):
    return ((n + m - 1) // m) * m


def _pick_row_tile(rows, lanes, x_isz, pe_isz, sublane, ws_budget_bytes):
    """Largest row tile whose double-buffered working set
    (2 x (x_block + out_block + pe_block)) fits the budget."""
    per_row = 2 * lanes * (2 * x_isz + pe_isz)
    max_rows = max(sublane, ws_budget_bytes // per_row)
    if rows <= max_rows:
        return rows                                    # full extent: always a legal block
    # Prefer an exact multiple-of-sublane divisor (no padded tail block).
    t = (max_rows // sublane) * sublane
    cand = t
    while cand >= sublane:
        if rows % cand == 0:
            return cand
        cand -= sublane
    # No clean divisor: sublane-rounded tile + cdiv grid (padded tail block);
    # avoids the full-extent fallback that could blow VMEM on v7x.
    return max(sublane, t)


def positional_encoding_forward(x, pe=None):
    """x: [batch, seq_len, d_model] -> x + pe[:seq_len, :]."""
    B, S, D = x.shape
    if pe is None:
        pe = build_pe_table(S, D)
    if pe.ndim == 3:                                   # accept the (1, max_len, D) buffer form
        pe = pe[0]
    pe = pe[:S, :D].astype(x.dtype)                    # keep PE in the input dtype

    x_isz = jnp.dtype(x.dtype).itemsize
    pe_isz = x_isz
    sublane = {4: 8, 2: 16, 1: 32}.get(x_isz, 8)

    # --- Layout selection: always lane-dense (multiple of 128 lanes). ---
    pad = 0
    if D % 128 == 0:
        x_v, pe_v, R, L = x, pe, S, D
    elif (S * D) % 128 == 0:
        R, L = (S * D) // 128, 128
        x_v, pe_v = x.reshape(B, R, L), pe.reshape(R, L)
    else:
        L = _round_up(D, 128)
        pad = L - D
        x_v = jnp.pad(x, ((0, 0), (0, 0), (0, pad)))
        pe_v = jnp.pad(pe, ((0, 0), (0, pad)))
        R = S

    # --- Tiny inputs: fold batch into rows so blocks fill whole vreg tiles. ---
    Bk, Rk = B, R
    if R < sublane and B > 1:
        pe_v = jnp.broadcast_to(pe_v[None], (B, R, L)).reshape(B * R, L)
        x_v = x_v.reshape(1, B * R, L)
        Bk, Rk = 1, B * R

    # --- Dtype-aware tile sizing from the real pipeline footprint. ---
    WS_BUDGET = 24 << 20                               # total working set; safe within v7x 64 MiB
    TS = _pick_row_tile(Rk, L, x_isz, pe_isz, sublane, WS_BUDGET)

    # Ensure >=2 programs on a parallel axis so both v7x TensorCores engage.
    n_row_blocks = -(-Rk // TS)
    if Bk == 1 and n_row_blocks < 2 and Rk > sublane:
        half = _round_up(-(-Rk // 2), sublane)
        if half < Rk:
            TS = half
            n_row_blocks = -(-Rk // TS)

    grid = (n_row_blocks, Bk)                          # batch innermost: PE block stays resident

    # vmem limit derived from the actual block footprint (+ headroom), capped for v7x.
    block_bytes = 2 * TS * L * (2 * x_isz + pe_isz)
    vmem_limit = int(min(max(block_bytes + (8 << 20), 16 << 20), 48 << 20))

    out = pl.pallas_call(
        _add_pe_kernel,
        out_shape=jax.ShapeDtypeStruct((Bk, Rk, L), x.dtype),
        grid_spec=pl.GridSpec(
            grid=grid,
            in_specs=[
                # batch dim squeezed out of the kernel view
                pl.BlockSpec((None, TS, L), lambda s, b: (b, s, 0)),
                # PE ignores the batch grid axis -> amortized across the batch loop
                pl.BlockSpec((TS, L), lambda s, b: (s, 0)),
            ],
            out_specs=pl.BlockSpec((None, TS, L), lambda s, b: (b, s, 0)),
        ),
        compiler_params=pltpu.CompilerParams(
            dimension_semantics=("parallel", "parallel"),
            vmem_limit_bytes=vmem_limit,
        ),
    )(x_v, pe_v)

    if pad:
        return out.reshape(B, S, L)[:, :, :D]
    return out.reshape(B, S, D)


if __name__ == "__main__":
    key = jax.random.PRNGKey(0)

    # Precompute the PE buffer once (mirrors the PyTorch registered buffer).
    MAX_LEN = 5000

    # Shape 1: [batch, seq_len, d_model] = [2, 8, 32]; d_model < 128 -> fold + batch-fold path.
    B, S, D = 2, 8, 32
    pe_buf = build_pe_table(MAX_LEN, D)
    x = jax.random.normal(key, (B, S, D), dtype=jnp.float32)
    ref = x + pe_buf[None, :S, :]
    out = jax.block_until_ready(positional_encoding_forward(x, pe=pe_buf))
    assert out.shape == (B, S, D)
    assert jnp.allclose(out, ref, atol=1e-5, rtol=1e-5), "mismatch vs reference (f32, D=32)"

    # Shape 2: d_model multiple of 128 -> natural (B, S, D) tiling path.
    B2, S2, D2 = 2, 64, 256
    pe_buf2 = build_pe_table(MAX_LEN, D2)
    x2 = jax.random.normal(jax.random.PRNGKey(1), (B2, S2, D2), dtype=jnp.float32)
    ref2 = x2 + pe_buf2[None, :S2, :]
    out2 = jax.block_until_ready(positional_encoding_forward(x2, pe=pe_buf2))
    assert jnp.allclose(out2, ref2, atol=1e-5, rtol=1e-5), "mismatch vs reference (f32, D=256)"

    # Shape 3: bf16 input -> PE kept in bf16 (half DMA), 16-sublane tile rounding.
    B3, S3, D3 = 2, 128, 512
    pe_buf3 = build_pe_table(MAX_LEN, D3)
    x3 = jax.random.normal(jax.random.PRNGKey(2), (B3, S3, D3), dtype=jnp.bfloat16)
    ref3 = x3 + pe_buf3[None, :S3, :].astype(jnp.bfloat16)
    out3 = jax.block_until_ready(positional_encoding_forward(x3, pe=pe_buf3))
    assert jnp.allclose(out3.astype(jnp.float32), ref3.astype(jnp.float32),
                        atol=1e-2, rtol=1e-2), "mismatch vs reference (bf16, D=512)"

    # Shape 4: awkward dims (neither D nor S*D multiple of 128) -> lane-pad path, still dense stores.
    B4, S4, D4 = 2, 5, 96
    x4 = jax.random.normal(jax.random.PRNGKey(3), (B4, S4, D4), dtype=jnp.float32)
    ref4 = x4 + build_pe_table(S4, D4)[None]
    out4 = jax.block_until_ready(positional_encoding_forward(x4))   # pe=None fallback
    assert jnp.allclose(out4, ref4, atol=1e-5, rtol=1e-5), "mismatch vs reference (f32, D=96)"

    print("KERNEL_OK")
</pallas_src>

<mosaic_0001>
module attributes {stable_mosaic.version = 11 : i64} {
  func.func @_add_pe_kernel(%arg0: i32, %arg1: i32, %arg2: memref<1x4x128xf32, #tpu.memory_space<vmem>>, %arg3: memref<4x128xf32, #tpu.memory_space<vmem>>, %arg4: memref<1x4x128xf32, #tpu.memory_space<vmem>>) attributes {dimension_semantics = [#tpu.dimension_semantics<parallel>, #tpu.dimension_semantics<parallel>], iteration_bounds = array<i64: 1, 1>, scalar_prefetch = 0 : i64, scratch_operands = 0 : i64, tpu.core_type = #tpu.core_type<tc>, window_params = [{transform_indices = @transform_0, window_bounds = array<i64: 1, 4, 128>}, {transform_indices = @transform_1, window_bounds = array<i64: 4, 128>}, {transform_indices = @transform_2, window_bounds = array<i64: 1, 4, 128>}]} {
    %c0 = arith.constant 0 : index
    %c0_0 = arith.constant 0 : index
    %c0_1 = arith.constant 0 : index
    %0 = vector.load %arg2[%c0, %c0_0, %c0_1] : memref<1x4x128xf32, #tpu.memory_space<vmem>>, vector<1x4x128xf32>
    %1 = vector.shape_cast %0 : vector<1x4x128xf32> to vector<4x128xf32>
    %c0_2 = arith.constant 0 : index
    %c0_3 = arith.constant 0 : index
    %2 = vector.load %arg3[%c0_2, %c0_3] : memref<4x128xf32, #tpu.memory_space<vmem>>, vector<4x128xf32>
    %3 = arith.addf %1, %2 : vector<4x128xf32>
    %c0_4 = arith.constant 0 : index
    %c0_5 = arith.constant 0 : index
    %c0_6 = arith.constant 0 : index
    %4 = vector.load %arg4[%c0_4, %c0_5, %c0_6] : memref<1x4x128xf32, #tpu.memory_space<vmem>>, vector<1x4x128xf32>
    %5 = vector.shape_cast %4 : vector<1x4x128xf32> to vector<4x128xf32>
    %6 = vector.shape_cast %3 : vector<4x128xf32> to vector<1x4x128xf32>
    tpu.vector_store %arg4[%c0_4, %c0_5, %c0_6], %6 {strides = array<i32>} : memref<1x4x128xf32, #tpu.memory_space<vmem>>, vector<1x4x128xf32>,
    return
  }
  func.func @transform_0(%arg0: i32, %arg1: i32) -> (i32, i32, i32) {
    %c0_i32 = arith.constant 0 : i32
    %c0_i32_0 = arith.constant 0 : i32
    return %arg1, %arg0, %c0_i32 : i32, i32, i32
  }
  func.func @transform_1(%arg0: i32, %arg1: i32) -> (i32, i32) {
    %c0_i32 = arith.constant 0 : i32
    %c0_i32_0 = arith.constant 0 : i32
    return %arg0, %c0_i32 : i32, i32
  }
  func.func @transform_2(%arg0: i32, %arg1: i32) -> (i32, i32, i32) {
    %c0_i32 = arith.constant 0 : i32
    %c0_i32_0 = arith.constant 0 : i32
    return %arg1, %arg0, %c0_i32 : i32, i32, i32
  }
}

</mosaic_0001>

<bundles_post_ra>
// kernel: tpu_custom_call.1
= control target key start
LH: loop header
LB: loop body
LE: loop exit
PB: predicated region body
PF: predicated region fallthrough
CT: control target
= control target key end

     0   :  { %7 = vsyncpa [#allocation3], 0  ;;  %s152_s0 = inlined_call_operand.hbm [shape: f32[1,4,128], index: 0, kind: input, shape index: {}]   ;;  %s153_s1 = inlined_call_operand.hbm [shape: f32[4,128], index: 1, kind: input, shape index: {}]   ;;  %s154_s2 = inlined_call_operand.hbm [shape: f32[1,4,128], index: 2, kind: output, shape index: {}]  }
   0x1   :  { %8 = vsyncpa [#allocation6], 0 }
   0x2   :  { %9 = vsyncpa [#allocation4], 0  ;;  %s125_s9 = smov [#allocation2]   ;;  %s126_s11 = smov [#allocation5]  }
   0x3   :  { %s16_s10 = sshll.u32 %s125_s9, 4  ;;  %s26_s12 = sshll.u32 %s126_s11, 4  ;;  %s17_s10 = int_to_ptr.vmem [resolvable:$true] %s16_s10  ;;  %s27_s12 = int_to_ptr.vmem [resolvable:$true] %s26_s12 }
   0x4   :  { %s67_s13 = scalar_lea.vmem %s17_s10, 64  ;;  %p72_p1 = scmp.lt.s32.totalorder %s17_s10, %s17_s10 }
   0x5   :  { %p68_p0 = scmp.ne.s32.totalorder %s17_s10, %s67_s13  ;;  %p73_p2 = scmp.lt.s32.totalorder %s67_s13, %s67_s13 }
   0x7   :  { %p74_p3 = por %p73_p2, %p72_p1 }
   0x9   :  { %p75_p4 = pnand %p74_p3, %p68_p0 }
   0xb   :  { %78 = shalt.err (!%p75_p4)
}
   0xc   :  { %19 = dma.hbm_to_vmem [thread:$0]  %s152_s0, 64, %s17_s10, [#allocation3]  }
   0xd   :  { %s87_s16 = scalar_lea.vmem %s27_s12, 64  ;;  %p92_p6 = scmp.lt.s32.totalorder %s27_s12, %s27_s12 }
   0xe   :  { %p88_p5 = scmp.ne.s32.totalorder %s27_s12, %s87_s16  ;;  %p93_p7 = scmp.lt.s32.totalorder %s87_s16, %s87_s16 }
  0x10   :  { %p94_p8 = por %p93_p7, %p92_p6 }
  0x12   :  { %p95_p9 = pnand %p94_p8, %p88_p5 }
  0x14   :  { %98 = shalt.err (!%p95_p9)
}
  0x15   :  { %29 = dma.hbm_to_vmem [thread:$0]  %s153_s1, 64, %s27_s12, [#allocation6]  }
  0x16   :  { %119 = dma.done.wait [#allocation3], 64  }
  0x17   :  { %120 = vsyncadd [#allocation3], 4294967232 }
  0x18   :  { %121 = dma.done.wait [#allocation6], 64  }
  0x19   :  { %122 = vsyncadd [#allocation6], 4294967232  ;;  %s127_s19 = smov [#allocation7]   ;;  %v36_v0 = vld [vmem:[#allocation2] sm:$0xf] }
  0x1a   :  { %s46_s20 = sshll.u32 %s127_s19, 4  ;;  %v37_v1 = vld [vmem:[#allocation5] sm:$0xf]  ;;  %s47_s20 = int_to_ptr.vmem [resolvable:$true] %s46_s20 }
  0x1b   :  { %v38_v2 = vadd.f32 %v37_v1, %v36_v0  ;;  %s99_s0 = scalar_lea.vmem %s47_s20, 64  ;;  %p104_p11 = scmp.lt.s32.totalorder %s47_s20, %s47_s20 }
  0x1c   :  { %p100_p10 = scmp.ne.s32.totalorder %s47_s20, %s99_s0  ;;  %p105_p12 = scmp.lt.s32.totalorder %s99_s0, %s99_s0 }
  0x1d   :  { %39 = vst [vmem:[#allocation7] sm:$0xf] %v38_v2 }
  0x1e   :  { %p106_p13 = por %p105_p12, %p104_p11 }
  0x20   :  { %p107_p0 = pnand %p106_p13, %p100_p10 }
  0x22   :  { %110 = shalt.err (!%p107_p0)
}
  0x23   :  { %49 = dma.vmem_to_hbm [thread:$0]  %s47_s20, 64, %s154_s2, [#allocation4]  }
  0x24   :  { %123 = dma.done.wait [#allocation4], 64  }
  0x25   :  { %124 = vsyncadd [#allocation4], 4294967232 }
  0x26   :  { %53 = vsyncpa [#allocation3], 1 }
  0x27   :  { %54 = vsyncpa [#allocation6], 1 }
  0x28   :  { %55 = vsyncpa [#allocation4], 1 }

</bundles_post_ra>
